<compile_context>
chip_gen: v7x
topology: tpu7x:2x2x1
jax: 0.10.0
libtpu: 0.0.40
codegen_flags: <defaults>
</compile_context>

<pallas_src>
import functools

import jax
import jax.numpy as jnp
from jax.experimental import pallas as pl
from jax.experimental.pallas import tpu as pltpu


def _round_up(n, m):
    return ((n + m - 1) // m) * m


def _mlp_kernel(x_ref, w1_ref, b1_ref, w2_ref, b2_ref, w3_ref, b3_ref, o_ref,
                *, compute_dtype):
    # In-kernel cast of the streamed x tile (VPU cast slot has plenty of slack here);
    # keeps x f32 in HBM and avoids a separate wrapper-side cast pass.
    x = x_ref[...].astype(compute_dtype)
    # fc1 + ReLU  (bf16 operands, f32 MXU accumulation, f32 epilogue)
    h = jnp.dot(x, w1_ref[...], preferred_element_type=jnp.float32)
    h = jnp.maximum(h + b1_ref[...], 0.0)
    # fc2 + ReLU
    h = jnp.dot(h.astype(compute_dtype), w2_ref[...], preferred_element_type=jnp.float32)
    h = jnp.maximum(h + b2_ref[...], 0.0)
    # fc3 (real output width, no padding) + sigmoid
    h = jnp.dot(h.astype(compute_dtype), w3_ref[...], preferred_element_type=jnp.float32)
    o_ref[...] = jax.nn.sigmoid(h + b3_ref[...]).astype(o_ref.dtype)


@functools.partial(jax.jit, static_argnames=("block_b", "use_bf16"))
def fully_connected_decoder2(x, w1, b1, w2, b2, w3, b3, *, block_b=1024, use_bf16=True):
    """x: (B, in_features) f32. Weights stored transposed vs PyTorch: (in, out).
    Returns sigmoid(fc3(relu(fc2(relu(fc1(x)))))) of shape (B, out_in_features), f32."""
    B, in_features = x.shape
    h1 = w1.shape[1]            # 128
    h2 = w2.shape[1]            # 64
    out_features = w3.shape[1]  # out_in_features

    compute_dtype = jnp.bfloat16 if use_bf16 else jnp.float32

    # Weights are tiny and fetched once -> cast in the wrapper (negligible bytes).
    w1 = w1.astype(compute_dtype)
    w2 = w2.astype(compute_dtype)
    w3 = w3.astype(compute_dtype)
    b1 = b1.astype(jnp.float32)
    b2 = b2.astype(jnp.float32)
    b3 = b3.astype(jnp.float32)

    # ---- balanced batch tiling -------------------------------------------------------
    # Pick the number of blocks first, then size each block to round_up(cdiv(B,n), 8),
    # so awkward B isn't padded with hundreds of wasted (computed + written) rows.
    blk = max(8, _round_up(min(block_b, B), 8))
    n_blocks = pl.cdiv(B, blk)
    if n_blocks == 1 and B > 16:
        n_blocks = 2                      # give v7x's second TensorCore work
    blk = max(8, _round_up(pl.cdiv(B, n_blocks), 8))
    n_blocks = pl.cdiv(B, blk)
    b_pad = n_blocks * blk
    if b_pad != B:
        x = jnp.pad(x, ((0, b_pad - B), (0, 0)))

    cost = pl.CostEstimate(
        flops=2 * b_pad * (in_features * h1 + h1 * h2 + h2 * out_features),
        transcendentals=b_pad * out_features,          # sigmoid
        bytes_accessed=(x.size * x.dtype.itemsize
                        + b_pad * out_features * 4
                        + sum(a.size * a.dtype.itemsize
                              for a in (w1, b1, w2, b2, w3, b3))),
    )

    kernel = functools.partial(_mlp_kernel, compute_dtype=compute_dtype)

    out = pl.pallas_call(
        kernel,
        out_shape=jax.ShapeDtypeStruct((b_pad, out_features), jnp.float32),
        grid_spec=pltpu.PrefetchScalarGridSpec(
            num_scalar_prefetch=0,
            grid=(n_blocks,),
            in_specs=[
                pl.BlockSpec((blk, in_features), lambda i: (i, 0)),   # x tile (streamed, f32)
                pl.BlockSpec((in_features, h1), lambda i: (0, 0)),    # W1 (resident)
                pl.BlockSpec((1, h1), lambda i: (0, 0)),              # b1
                pl.BlockSpec((h1, h2), lambda i: (0, 0)),             # W2
                pl.BlockSpec((1, h2), lambda i: (0, 0)),              # b2
                pl.BlockSpec((h2, out_features), lambda i: (0, 0)),   # W3 (real width)
                pl.BlockSpec((1, out_features), lambda i: (0, 0)),    # b3 (real width)
            ],
            out_specs=pl.BlockSpec((blk, out_features), lambda i: (i, 0)),
        ),
        compiler_params=pltpu.CompilerParams(
            dimension_semantics=("parallel",),         # megacore sharding on v7x
        ),
        cost_estimate=cost,
    )(x, w1, b1, w2, b2, w3, b3)

    # Only slice when batch padding was actually introduced (no extra HBM pass otherwise).
    if b_pad != B:
        out = out[:B]
    return out


def _init_linear(key, fan_in, fan_out):
    """nn.Linear-style init. Returns W (fan_in, fan_out) (transposed vs PyTorch), b (1, fan_out)."""
    kw, kb = jax.random.split(key)
    bound = 1.0 / jnp.sqrt(fan_in)
    w = jax.random.uniform(kw, (fan_in, fan_out), jnp.float32, -bound, bound)
    b = jax.random.uniform(kb, (1, fan_out), jnp.float32, -bound, bound)
    return w, b


def _reference(x, w1, b1, w2, b2, w3, b3, use_bf16):
    cd = jnp.bfloat16 if use_bf16 else jnp.float32
    h = jnp.dot(x.astype(cd), w1.astype(cd), preferred_element_type=jnp.float32) + b1
    h = jnp.maximum(h, 0.0)
    h = jnp.dot(h.astype(cd), w2.astype(cd), preferred_element_type=jnp.float32) + b2
    h = jnp.maximum(h, 0.0)
    h = jnp.dot(h.astype(cd), w3.astype(cd), preferred_element_type=jnp.float32) + b3
    return jax.nn.sigmoid(h)


if __name__ == "__main__":
    key = jax.random.PRNGKey(0)
    k_x, k1, k2, k3 = jax.random.split(key, 4)

    # Small shapes consistent with the module.
    B = 8
    in_features = 32
    out_in_features = 16

    x = jax.random.normal(k_x, (B, in_features), jnp.float32)
    w1, b1 = _init_linear(k1, in_features, 128)
    w2, b2 = _init_linear(k2, 128, 64)
    w3, b3 = _init_linear(k3, 64, out_in_features)

    out = fully_connected_decoder2(x, w1, b1, w2, b2, w3, b3)
    out = jax.block_until_ready(out)
    assert out.shape == (B, out_in_features)

    # Tight check vs a reference using the same bf16-operand / f32-accum numerics.
    ref_bf16 = _reference(x, w1, b1, w2, b2, w3, b3, use_bf16=True)
    assert jnp.allclose(out, ref_bf16, atol=1e-3, rtol=1e-3), "mismatch vs bf16 reference"

    # Loose check vs the pure-f32 PyTorch-equivalent forward pass.
    ref_f32 = _reference(x, w1, b1, w2, b2, w3, b3, use_bf16=False)
    assert jnp.allclose(out, ref_f32, atol=2e-2, rtol=2e-2), "mismatch vs f32 reference"

    print("KERNEL_OK")
</pallas_src>

<mosaic_0001>
module attributes {stable_mosaic.version = 11 : i64} {
  func.func @_mlp_kernel(%arg0: i32, %arg1: memref<8x32xf32, #tpu.memory_space<vmem>>, %arg2: memref<32x128xbf16, #tpu.memory_space<vmem>>, %arg3: memref<1x128xf32, #tpu.memory_space<vmem>>, %arg4: memref<128x64xbf16, #tpu.memory_space<vmem>>, %arg5: memref<1x64xf32, #tpu.memory_space<vmem>>, %arg6: memref<64x16xbf16, #tpu.memory_space<vmem>>, %arg7: memref<1x16xf32, #tpu.memory_space<vmem>>, %arg8: memref<8x16xf32, #tpu.memory_space<vmem>>) attributes {dimension_semantics = [#tpu.dimension_semantics<parallel>], iteration_bounds = array<i64: 1>, scalar_prefetch = 0 : i64, scratch_operands = 0 : i64, tpu.core_type = #tpu.core_type<tc>, window_params = [{transform_indices = @transform_0, window_bounds = array<i64: 8, 32>}, {pipeline_mode = #tpu.pipeline_mode<synchronous>, transform_indices = @transform_1, window_bounds = array<i64: 32, 128>}, {pipeline_mode = #tpu.pipeline_mode<synchronous>, transform_indices = @transform_2, window_bounds = array<i64: 1, 128>}, {pipeline_mode = #tpu.pipeline_mode<synchronous>, transform_indices = @transform_3, window_bounds = array<i64: 128, 64>}, {pipeline_mode = #tpu.pipeline_mode<synchronous>, transform_indices = @transform_4, window_bounds = array<i64: 1, 64>}, {pipeline_mode = #tpu.pipeline_mode<synchronous>, transform_indices = @transform_5, window_bounds = array<i64: 64, 16>}, {pipeline_mode = #tpu.pipeline_mode<synchronous>, transform_indices = @transform_6, window_bounds = array<i64: 1, 16>}, {transform_indices = @transform_7, window_bounds = array<i64: 8, 16>}]} {
    %c0 = arith.constant 0 : index
    %c0_0 = arith.constant 0 : index
    %0 = vector.load %arg1[%c0, %c0_0] : memref<8x32xf32, #tpu.memory_space<vmem>>, vector<8x32xf32>
    %1 = arith.truncf %0 : vector<8x32xf32> to vector<8x32xbf16>
    %c0_1 = arith.constant 0 : index
    %c0_2 = arith.constant 0 : index
    %2 = vector.load %arg2[%c0_1, %c0_2] : memref<32x128xbf16, #tpu.memory_space<vmem>>, vector<32x128xbf16>
    %cst = arith.constant dense<0.000000e+00> : vector<8x128xf32>
    %3 = tpu.matmul %1, %2, %cst {dimension_numbers = #tpu.dot_dimension_numbers<[1], [0], [0], [1], [0, 0, 1, 1], [], []>} : vector<8x32xbf16>, vector<32x128xbf16>, vector<8x128xf32> -> vector<8x128xf32>
    %c0_3 = arith.constant 0 : index
    %c0_4 = arith.constant 0 : index
    %4 = vector.load %arg3[%c0_3, %c0_4] : memref<1x128xf32, #tpu.memory_space<vmem>>, vector<1x128xf32>
    %5 = vector.broadcast %4 : vector<1x128xf32> to vector<8x128xf32>
    %6 = arith.addf %3, %5 : vector<8x128xf32>
    %cst_5 = arith.constant 0.000000e+00 : f32
    %7 = vector.broadcast %cst_5 : f32 to vector<8x128xf32>
    %8 = arith.maximumf %6, %7 : vector<8x128xf32>
    %9 = arith.truncf %8 : vector<8x128xf32> to vector<8x128xbf16>
    %c0_6 = arith.constant 0 : index
    %c0_7 = arith.constant 0 : index
    %10 = vector.load %arg4[%c0_6, %c0_7] : memref<128x64xbf16, #tpu.memory_space<vmem>>, vector<128x64xbf16>
    %cst_8 = arith.constant dense<0.000000e+00> : vector<8x64xf32>
    %11 = tpu.matmul %9, %10, %cst_8 {dimension_numbers = #tpu.dot_dimension_numbers<[1], [0], [0], [1], [0, 0, 1, 1], [], []>} : vector<8x128xbf16>, vector<128x64xbf16>, vector<8x64xf32> -> vector<8x64xf32>
    %c0_9 = arith.constant 0 : index
    %c0_10 = arith.constant 0 : index
    %12 = vector.load %arg5[%c0_9, %c0_10] : memref<1x64xf32, #tpu.memory_space<vmem>>, vector<1x64xf32>
    %13 = vector.broadcast %12 : vector<1x64xf32> to vector<8x64xf32>
    %14 = arith.addf %11, %13 : vector<8x64xf32>
    %cst_11 = arith.constant 0.000000e+00 : f32
    %15 = vector.broadcast %cst_11 : f32 to vector<8x64xf32>
    %16 = arith.maximumf %14, %15 : vector<8x64xf32>
    %17 = arith.truncf %16 : vector<8x64xf32> to vector<8x64xbf16>
    %c0_12 = arith.constant 0 : index
    %c0_13 = arith.constant 0 : index
    %18 = vector.load %arg6[%c0_12, %c0_13] : memref<64x16xbf16, #tpu.memory_space<vmem>>, vector<64x16xbf16>
    %cst_14 = arith.constant dense<0.000000e+00> : vector<8x16xf32>
    %19 = tpu.matmul %17, %18, %cst_14 {dimension_numbers = #tpu.dot_dimension_numbers<[1], [0], [0], [1], [0, 0, 1, 1], [], []>} : vector<8x64xbf16>, vector<64x16xbf16>, vector<8x16xf32> -> vector<8x16xf32>
    %c0_15 = arith.constant 0 : index
    %c0_16 = arith.constant 0 : index
    %20 = vector.load %arg7[%c0_15, %c0_16] : memref<1x16xf32, #tpu.memory_space<vmem>>, vector<1x16xf32>
    %21 = vector.broadcast %20 : vector<1x16xf32> to vector<8x16xf32>
    %22 = arith.addf %19, %21 : vector<8x16xf32>
    %23 = arith.negf %22 : vector<8x16xf32>
    %24 = math.exp %23 : vector<8x16xf32>
    %cst_17 = arith.constant 1.000000e+00 : f32
    %25 = vector.broadcast %cst_17 : f32 to vector<8x16xf32>
    %26 = arith.addf %25, %24 : vector<8x16xf32>
    %27 = arith.divf %25, %26 : vector<8x16xf32>
    %c0_18 = arith.constant 0 : index
    %c0_19 = arith.constant 0 : index
    %28 = vector.load %arg8[%c0_18, %c0_19] : memref<8x16xf32, #tpu.memory_space<vmem>>, vector<8x16xf32>
    tpu.vector_store %arg8[%c0_18, %c0_19], %27 {strides = array<i32>} : memref<8x16xf32, #tpu.memory_space<vmem>>, vector<8x16xf32>,
    return
  }
  func.func @transform_0(%arg0: i32) -> (i32, i32) {
    %c0_i32 = arith.constant 0 : i32
    %c0_i32_0 = arith.constant 0 : i32
    return %arg0, %c0_i32 : i32, i32
  }
  func.func @transform_1(%arg0: i32) -> (i32, i32) {
    %c0_i32 = arith.constant 0 : i32
    %c0_i32_0 = arith.constant 0 : i32
    %c0_i32_1 = arith.constant 0 : i32
    return %c0_i32, %c0_i32_0 : i32, i32
  }
  func.func @transform_2(%arg0: i32) -> (i32, i32) {
    %c0_i32 = arith.constant 0 : i32
    %c0_i32_0 = arith.constant 0 : i32
    %c0_i32_1 = arith.constant 0 : i32
    return %c0_i32, %c0_i32_0 : i32, i32
  }
  func.func @transform_3(%arg0: i32) -> (i32, i32) {
    %c0_i32 = arith.constant 0 : i32
    %c0_i32_0 = arith.constant 0 : i32
    %c0_i32_1 = arith.constant 0 : i32
    return %c0_i32, %c0_i32_0 : i32, i32
  }
  func.func @transform_4(%arg0: i32) -> (i32, i32) {
    %c0_i32 = arith.constant 0 : i32
    %c0_i32_0 = arith.constant 0 : i32
    %c0_i32_1 = arith.constant 0 : i32
    return %c0_i32, %c0_i32_0 : i32, i32
  }
  func.func @transform_5(%arg0: i32) -> (i32, i32) {
    %c0_i32 = arith.constant 0 : i32
    %c0_i32_0 = arith.constant 0 : i32
    %c0_i32_1 = arith.constant 0 : i32
    return %c0_i32, %c0_i32_0 : i32, i32
  }
  func.func @transform_6(%arg0: i32) -> (i32, i32) {
    %c0_i32 = arith.constant 0 : i32
    %c0_i32_0 = arith.constant 0 : i32
    %c0_i32_1 = arith.constant 0 : i32
    return %c0_i32, %c0_i32_0 : i32, i32
  }
  func.func @transform_7(%arg0: i32) -> (i32, i32) {
    %c0_i32 = arith.constant 0 : i32
    %c0_i32_0 = arith.constant 0 : i32
    return %arg0, %c0_i32 : i32, i32
  }
}

</mosaic_0001>

<bundles_post_ra>
// kernel: fully_connected_decoder2.1
= control target key start
LH: loop header
LB: loop body
LE: loop exit
PB: predicated region body
PF: predicated region fallthrough
CT: control target
= control target key end

     0   :  { %v439_v1 = vmov 0.0   ;;  %vm440_vm0 = vmmov 0   ;;  %vm53_vm1 = vcmask 261120   ;;  %s551_s0 = inlined_call_operand.vmem [shape: f32[8,32], index: 0, kind: input, shape index: {}]   ;;  %s552_s1 = inlined_call_operand.vmem [shape: bf16[32,128], index: 1, kind: input, shape index: {}]   ;;  %s553_s2 = inlined_call_operand.vmem [shape: f32[1,128], index: 2, kind: input, shape index: {}]   ;;  %s554_s3 = inlined_call_operand.vmem [shape: bf16[128,64], index: 3, kind: input, shape index: {}]   ;;  %s555_s4 = inlined_call_operand.vmem [shape: f32[1,64], index: 4, kind: input, shape index: {}]   ;;  %s556_s5 = inlined_call_operand.vmem [shape: bf16[64,16], index: 5, kind: input, shape index: {}]   ;;  %s557_s6 = inlined_call_operand.vmem [shape: f32[1,16], index: 6, kind: input, shape index: {}]   ;;  %s558_s7 = inlined_call_operand.hbm [shape: f32[8,16], index: 7, kind: output, shape index: {}]  }
   0x1   :  { %v397_v0 = vld [vmem:[%s552_s1] sm:$0xff]   ;;  %354 = vmatprep.subr.bf16.mxu0 %v439_v1  ;;  %v398_v2 = vld [vmem:[%s552_s1 + $0x8] sm:$0xff]   ;;  %362 = vmatprep.subr.bf16.mxu1 %v439_v1  ;;  %v401_v7 = vld [vmem:[%s554_s3 + $0x10] sm:$0xff]  }
   0x2   :  { %355 = vmatpush3.bf16.msra.mxu0 %v397_v0  ;;  %358 = vmatprep.mubr.msk.bf16.mxu0 %vm440_vm0, %v439_v1  ;;  %v28_v3 = vld [vmem:[%s551_s0] sm:$0xff]  ;;  %v400_v6 = vld [vmem:[%s554_s3 + $0x8] sm:$0xff]  }
   0x3   :  { %356 = vmatprep.subr.bf16.mxu0 %v439_v1  ;;  %v399_v4 = vld [vmem:[%s554_s3] sm:$0xff]   ;;  %378 = vmatprep.mubr.msk.bf16.mxu1 %vm440_vm0, %v439_v1  ;;  %v29_v5 = vpack.c.bf16 %v28_v3, %v28_v3 }
   0x4   :  { %363 = vmatpush3.bf16.msra.mxu1 %v399_v4 }
   0x5   :  { %364 = vmatprep.subr.bf16.mxu1 %v439_v1 }
   0x6   :  { %357 = vmatpush3.bf16.msra.mxu0 %v398_v2 }
   0x7   :  { %382 = vmatprep.subr.bf16.mxu0 %v439_v1 }
   0x8   :  { %365 = vmatpush3.bf16.msra.mxu1 %v400_v6 }
   0x9   :  { %359 = vmatmul.mubr.msk.bf16.vlgmr.msra.gmra.mrb[0].mxu0 %vm53_vm1, %v29_v5  ;;  %366 = vmatprep.subr.bf16.mxu1 %v439_v1 }
   0xa   :  { %390 = vmatprep.mubr.msk.bf16.mxu0 %vm440_vm0, %v439_v1 }
   0xb   :  { %12 = vsyncpa [#allocation3], 0  ;;  %v402_v8 = vld [vmem:[%s554_s3 + $0x18] sm:$0xff]   ;;  %v403_v9 = vld [vmem:[%s554_s3 + $0x20] sm:$0xff]   ;;  %vm251_vm2 = vcmask 523264   ;;  %vm301_vm3 = vcmask 130048  }
   0xc   :  { %367 = vmatpush3.bf16.msra.mxu1 %v401_v7  ;;  %v404_v10 = vld [vmem:[%s554_s3 + $0x28] sm:$0xff]   ;;  %v405_v11 = vld [vmem:[%s554_s3 + $0x30] sm:$0xff]   ;;  %v406_v12 = vld [vmem:[%s554_s3 + $0x38] sm:$0xff]  }
   0xd   :  { %368 = vmatprep.subr.bf16.mxu1 %v439_v1  ;;  %v407_v13 = vld [vmem:[%s556_s5] sm:$0xff]   ;;  %v408_v14 = vld [vmem:[%s556_s5 + $0x8] sm:$0xff]   ;;  %v409_v23 = vld [vmem:[%s556_s5 + $0x10] sm:$0xff]  }
   0xe   :  { %383 = vmatpush3.bf16.msra.mxu0 %v407_v13  ;;  %v317_v15 = vld [vmem:[%s553_s2] ss:$0 sm:$0xff]  ;;  %v410_v24 = vld [vmem:[%s556_s5 + $0x18] sm:$0xff]  }
   0xf   :  { %384 = vmatprep.subr.bf16.mxu0 %v439_v1  ;;  %v321_v25 = vld [vmem:[%s555_s4] ss:$0 sm:$0xff]  ;;  %s441_s4 = smov [#allocation2]  }
  0x10   :  { %369 = vmatpush3.bf16.msra.mxu1 %v402_v8  ;;  %v330_v33 = vld [vmem:[%s557_s6] ss:$0 sm:$0xff]  ;;  %s309_s5 = sshll.u32 %s441_s4, 4  ;;  %s310_s5 = int_to_ptr.vmem [resolvable:$true] %s309_s5 }
  0x11   :  { %370 = vmatprep.subr.bf16.mxu1 %v439_v1  ;;  %s415_s1 = scalar_lea.vmem %s310_s5, 128  ;;  %p420_p1 = scmp.lt.s32.totalorder %s310_s5, %s310_s5 }
  0x12   :  { %385 = vmatpush3.bf16.msra.mxu0 %v408_v14  ;;  %p416_p0 = scmp.ne.s32.totalorder %s310_s5, %s415_s1  ;;  %p421_p2 = scmp.lt.s32.totalorder %s415_s1, %s415_s1 }
  0x13   :  { %386 = vmatprep.subr.bf16.mxu0 %v439_v1 }
  0x14   :  { %371 = vmatpush3.bf16.msra.mxu1 %v403_v9  ;;  %p422_p3 = por %p421_p2, %p420_p1 }
  0x15   :  { %372 = vmatprep.subr.bf16.mxu1 %v439_v1 }
  0x16   :  { %387 = vmatpush3.bf16.msra.mxu0 %v409_v23  ;;  %p423_p4 = pnand %p422_p3, %p416_p0 }
  0x17   :  { %388 = vmatprep.subr.bf16.mxu0 %v439_v1 }
  0x18   :  { %373 = vmatpush3.bf16.msra.mxu1 %v404_v10 }
  0x19   :  { %374 = vmatprep.subr.bf16.mxu1 %v439_v1 }
  0x1a   :  { %389 = vmatpush3.bf16.msra.mxu0 %v410_v24 }
  0x1c   :  { %375 = vmatpush3.bf16.msra.mxu1 %v405_v11 }
  0x1d   :  { %376 = vmatprep.subr.bf16.mxu1 %v439_v1 }
  0x20   :  { %377 = vmatpush3.bf16.msra.mxu1 %v406_v12 }
  0xdc   :  { %v91_v16 = vpop.f32.mrb[0].mxu0 }
  0xdd   :  { %v92_v17 = vadd.f32 %v317_v15, %v91_v16  ;;  %v360_v18 = vpop.f32.mrb[1].mxu0 }
  0xde   :  { %v94_v19 = vpop.f32.mrb[2].mxu0 }
  0xdf   :  { %v97_v20 = vmax.f32 %v92_v17, 0.0  ;;  %v361_v21 = vpop.f32.mrb[3].mxu0 }
  0xe1   :  { %v98_v22 = vpack.c.bf16 %v97_v20, %v97_v20 }
  0xe3   :  { %379 = vmatmul.mubr.bf16.vlgmr.msra.gmra.mrb[0].mxu1 %v98_v22 }
 0x1b6   :  { %v204_v26 = vpop.f32.mrb[0].mxu1 }
 0x1b7   :  { %v205_v27 = vadd.f32 %v321_v25, %v204_v26  ;;  %v380_v28 = vpop.f32.mrb[1].mxu1 }
 0x1b8   :  { %v207_v29 = vpop.f32.mrb[2].mxu1 }
 0x1b9   :  { %v210_v30 = vmax.f32 %v205_v27, 0.0  ;;  %v381_v31 = vpop.f32.mrb[3].mxu1 }
 0x1bb   :  { %v211_v32 = vpack.c.bf16 %v210_v30, %v210_v30 }
 0x1bd   :  { %391 = vmatmul.mubr.msk.bf16.vlgmr.msra.gmra.mrb[4].mxu0 %vm251_vm2, %v211_v32 }
 0x290   :  { %v289_v34 = vpop.f32.mrb[4].mxu0 }
 0x291   :  { %v290_v35 = vadd.f32 %v330_v33, %v289_v34  ;;  %v392_v36 = vpop.f32.mrb[5].mxu0 }
 0x292   :  { %v292_v37 = vpop.f32.mrb[6].mxu0 }
 0x293   :  { %v336_v38 = vmul.f32 -1.442695, %v290_v35  ;;  %v393_v39 = vpop.f32.mrb[7].mxu0 }
 0x295   :  { %411 = vpow2.f32 %v336_v38 }
 0x29f   :  { %v412_v40 = vpop.eup %411 }
 0x2a0   :  { %v298_v41 = vadd.f32 1.0, %v412_v40 }
 0x2a2   :  { %413 = vrcp.f32 %v298_v41 }
 0x2ac   :  { %v414_v42 = vpop.eup %413 }
 0x2ad   :  { %302 = vst.msk [vmem:[#allocation2] sm:$0xff] %vm301_vm3, %v414_v42 }
 0x2ae   :  { %426 = shalt.err (!%p423_p4)
}
 0x2af   :  { %s427_s11 = scalar_lea.hbm %s558_s7, 128 }
 0x2b0   :  { %p428_p5 = scmp.ne.s32.totalorder %s558_s7, %s427_s11  ;;  %p431_p6 = scmp.lt.u32.totalorder %s427_s11, %s558_s7 }
 0x2b2   :  { %p433_p7 = pnand %p431_p6, %p428_p5 }
 0x2b4   :  { %436 = shalt.err (!%p433_p7)
}
 0x2b5   :  { %312 = dma.vmem_to_hbm [thread:$0]  %s310_s5, 128, %s558_s7, [#allocation3]  }
 0x2b6   :  { %437 = dma.done.wait [#allocation3], 128  }
 0x2b7   :  { %438 = vsyncadd [#allocation3], 4294967168 }
 0x2b8   :  { %316 = vsyncpa [#allocation3], 1 }

</bundles_post_ra>
